<compile_context>
chip_gen: v7x
topology: tpu7x:2x2x1
jax: 0.10.0
libtpu: 0.0.40
codegen_flags: <defaults>
</compile_context>

<pallas_src>
import functools

import jax
import jax.numpy as jnp
from jax import lax
from jax.experimental import pallas as pl
from jax.experimental.pallas import tpu as pltpu

BN_EPS = 1e-5
LANE = 128


def _pad_to(n, m=LANE):
    return ((n + m - 1) // m) * m


# ----------------------------- fused kernel ---------------------------------
def _generator_kernel(n_blocks, x_pad, out_pads, x_ref, *rest):
    """Fused generator forward.

    rest = [w_0, p_0, ..., w_{n-1}, p_{n-1}, w_final, b_final, out_ref, slab_ref]
    p_i stacks [bias; gamma; beta] as a (3, out_pad_i) array.
    slab_ref is a VMEM scratch (batch, x_pad + sum(out_pads)); the torch.cat
    chain is realized by writing each block's output into its column range and
    doing ONE matmul per Linear over slab[:, :cur].
    """
    out_ref = rest[2 * n_blocks + 2]
    slab_ref = rest[2 * n_blocks + 3]

    batch = slab_ref.shape[0]
    inv_n = 1.0 / float(batch)

    # Slab column order (append order): [x | y_0 | y_1 | ...].  Weight rows are
    # repacked to match at parameter-packing time, so no in-kernel slicing of
    # the weight refs is needed.
    slab_ref[:, 0:x_pad] = x_ref[...]
    cur = x_pad

    for i in range(n_blocks):
        w = rest[2 * i][...]              # (cur, out_pad_i), slab row order
        p = rest[2 * i + 1][...]          # (3, out_pad_i): [bias; gamma; beta]
        b = p[0:1, :]
        gamma = p[1:2, :]
        beta = p[2:3, :]

        # Linear: single contiguous-K matmul over the live slab prefix.
        y = jnp.dot(slab_ref[:, 0:cur], w,
                    preferred_element_type=jnp.float32) + b

        # BatchNorm1d (training mode, biased variance), one-pass stats:
        # both reductions are independent -> one fewer XLU latency per block.
        sum_y = jnp.sum(y, axis=0, keepdims=True)
        sum_y2 = jnp.sum(y * y, axis=0, keepdims=True)
        mean = sum_y * inv_n
        var = jnp.maximum(sum_y2 * inv_n - mean * mean, 0.0)
        scale = gamma * lax.rsqrt(var + BN_EPS)   # gamma folded into scale
        shift = beta - mean * scale
        z = jnp.maximum(y * scale + shift, 0.0)   # ReLU

        # Append to the slab (padded gamma/beta/bias columns keep padded lanes
        # exactly zero, so they never contaminate downstream matmuls).
        slab_ref[:, cur:cur + out_pads[i]] = z
        cur += out_pads[i]

    # Final Linear over the full slab.
    w_f = rest[2 * n_blocks][...]
    b_f = rest[2 * n_blocks + 1][...]
    out = jnp.dot(slab_ref[:, 0:cur], w_f,
                  preferred_element_type=jnp.float32) + b_f
    out_ref[...] = out.astype(out_ref.dtype)


# --------------------------- forward wrapper ---------------------------------
@functools.partial(jax.jit, static_argnames=("data_dim",))
def generator_forward(packed, x, data_dim):
    block_w = packed["block_w"]
    block_p = packed["block_p"]
    n_blocks = len(block_w)

    batch = int(x.shape[0])
    x_dim = int(x.shape[1])
    x_pad = _pad_to(x_dim)

    # Lane-pad x so the slab's x piece is 128-wide (zero cols x zero weight
    # rows contribute nothing).
    x_p = jnp.pad(x.astype(jnp.float32), ((0, 0), (0, x_pad - x_dim)))

    args = [x_p]
    for w, p in zip(block_w, block_p):
        args.append(w)
        args.append(p)
    args.append(packed["final_w"])
    args.append(packed["final_b"])

    out_pads = tuple(int(w.shape[1]) for w in block_w)
    out_pad_f = int(packed["final_w"].shape[1])
    slab_width = x_pad + sum(out_pads)

    # Explicit VMEM budget: inputs + output + activation slab, with headroom.
    arg_bytes = sum(int(a.size) * a.dtype.itemsize for a in args)
    resident = arg_bytes + batch * (slab_width + out_pad_f) * 4
    vmem_limit = int(min(96 << 20, max(2 * resident + (4 << 20), 16 << 20)))

    kernel = functools.partial(_generator_kernel, n_blocks, x_pad, out_pads)

    out = pl.pallas_call(
        kernel,
        out_shape=jax.ShapeDtypeStruct((batch, out_pad_f), jnp.float32),
        in_specs=[pl.BlockSpec(memory_space=pltpu.MemorySpace.VMEM)] * len(args),
        out_specs=pl.BlockSpec(memory_space=pltpu.MemorySpace.VMEM),
        scratch_shapes=[pltpu.VMEM((batch, slab_width), jnp.float32)],
        compiler_params=pltpu.CompilerParams(vmem_limit_bytes=vmem_limit),
    )(*args)

    return out[:, :data_dim]


# --------------------------- parameter handling -------------------------------
def init_generator_params(key, embedding_dim, gen_dims, data_dim):
    """Deterministic synthetic init (PyTorch-Linear-style uniform bounds)."""
    params = {"residuals": []}
    dim = embedding_dim
    for item in gen_dims:
        key, kw, kb, kg, kbeta = jax.random.split(key, 5)
        bound = 1.0 / jnp.sqrt(dim)
        params["residuals"].append(
            dict(
                w=jax.random.uniform(kw, (dim, item), jnp.float32, -bound, bound),
                b=jax.random.uniform(kb, (1, item), jnp.float32, -bound, bound),
                gamma=1.0 + 0.05 * jax.random.normal(kg, (1, item), jnp.float32),
                beta=0.05 * jax.random.normal(kbeta, (1, item), jnp.float32),
            )
        )
        dim += item
    key, kw, kb = jax.random.split(key, 3)
    bound = 1.0 / jnp.sqrt(dim)
    params["final_w"] = jax.random.uniform(kw, (dim, data_dim), jnp.float32, -bound, bound)
    params["final_b"] = jax.random.uniform(kb, (1, data_dim), jnp.float32, -bound, bound)
    return params


def pack_generator_params(params, embedding_dim):
    """One-time repack for the slab layout.

    PyTorch's torch.cat([out, input]) orders pieces newest-first; the in-kernel
    slab appends, i.e. orders them oldest-first [x | y_0 | y_1 | ...].  Each
    Linear's weight rows are therefore split per piece (newest-first, matching
    the torch layout), zero-padded to each piece's 128-multiple width, and
    reassembled in slab order.  Output columns are zero-padded to a
    128-multiple; padded bias/gamma/beta columns are zero so padded feature
    lanes stay exactly zero through BN+ReLU.
    """
    x_pad = _pad_to(embedding_dim)
    piece_widths = [embedding_dim]   # unpadded widths, newest-first
    piece_pads = [x_pad]             # padded widths, newest-first

    def repack_weight(w, out_dim, out_pad):
        groups = []
        off = 0
        for wdt, wpad in zip(piece_widths, piece_pads):   # newest-first split
            g = w[off:off + wdt, :]
            g = jnp.pad(g, ((0, wpad - wdt), (0, out_pad - out_dim)))
            groups.append(g)
            off += wdt
        assert off == w.shape[0]
        return jnp.concatenate(groups[::-1], axis=0)      # slab (append) order

    block_w, block_p = [], []
    for p in params["residuals"]:
        out_dim = p["w"].shape[1]
        out_pad = _pad_to(out_dim)
        block_w.append(repack_weight(p["w"], out_dim, out_pad))
        block_p.append(jnp.concatenate([
            jnp.pad(p["b"], ((0, 0), (0, out_pad - out_dim))),
            jnp.pad(p["gamma"], ((0, 0), (0, out_pad - out_dim))),
            jnp.pad(p["beta"], ((0, 0), (0, out_pad - out_dim))),
        ], axis=0))
        piece_widths.insert(0, out_dim)
        piece_pads.insert(0, out_pad)

    data_dim = params["final_w"].shape[1]
    out_pad_f = _pad_to(data_dim)
    final_w = repack_weight(params["final_w"], data_dim, out_pad_f)
    final_b = jnp.pad(params["final_b"], ((0, 0), (0, out_pad_f - data_dim)))

    return dict(
        block_w=tuple(block_w),
        block_p=tuple(block_p),
        final_w=final_w,
        final_b=final_b,
    )


# ------------------------------ reference -------------------------------------
def generator_reference(params, x):
    """Pure-JAX reference matching the PyTorch forward (training-mode BN)."""
    h = x
    for p in params["residuals"]:
        y = h @ p["w"] + p["b"]
        mean = jnp.mean(y, axis=0, keepdims=True)
        var = jnp.mean((y - mean) ** 2, axis=0, keepdims=True)
        y = p["gamma"] * (y - mean) * lax.rsqrt(var + BN_EPS) + p["beta"]
        y = jnp.maximum(y, 0.0)
        h = jnp.concatenate([y, h], axis=1)
    return h @ params["final_w"] + params["final_b"]


# -------------------------------- main ----------------------------------------
if __name__ == "__main__":
    batch = 8
    embedding_dim = 32
    gen_dims = (32, 32)
    data_dim = 16

    key = jax.random.PRNGKey(0)
    key, kx = jax.random.split(key)
    x = jax.random.normal(kx, (batch, embedding_dim), dtype=jnp.float32)

    params = init_generator_params(key, embedding_dim, gen_dims, data_dim)
    packed = pack_generator_params(params, embedding_dim)

    out = generator_forward(packed, x, data_dim=data_dim)
    out = jax.block_until_ready(out)

    ref = generator_reference(params, x)
    assert out.shape == (batch, data_dim), out.shape
    assert jnp.allclose(out, ref, atol=1e-4, rtol=1e-4), "mismatch vs reference"

    print("KERNEL_OK")
</pallas_src>

<mosaic_0001>
module attributes {stable_mosaic.version = 11 : i64} {
  func.func @_generator_kernel(%arg0: memref<8x128xf32, #tpu.memory_space<vmem>>, %arg1: memref<128x128xf32, #tpu.memory_space<vmem>>, %arg2: memref<3x128xf32, #tpu.memory_space<vmem>>, %arg3: memref<256x128xf32, #tpu.memory_space<vmem>>, %arg4: memref<3x128xf32, #tpu.memory_space<vmem>>, %arg5: memref<384x128xf32, #tpu.memory_space<vmem>>, %arg6: memref<1x128xf32, #tpu.memory_space<vmem>>, %arg7: memref<8x128xf32, #tpu.memory_space<vmem>>, %arg8: memref<8x384xf32, #tpu.memory_space<vmem>>) attributes {dimension_semantics = [], scalar_prefetch = 0 : i64, scratch_operands = 1 : i64, tpu.core_type = #tpu.core_type<tc>} {
    %c0 = arith.constant 0 : index
    %c0_0 = arith.constant 0 : index
    %0 = vector.load %arg0[%c0, %c0_0] : memref<8x128xf32, #tpu.memory_space<vmem>>, vector<8x128xf32>
    %c0_1 = arith.constant 0 : index
    %c0_2 = arith.constant 0 : index
    %1 = vector.load %arg8[%c0_1, %c0_2] : memref<8x384xf32, #tpu.memory_space<vmem>>, vector<8x128xf32>
    tpu.vector_store %arg8[%c0_1, %c0_2], %0 {strides = array<i32>} : memref<8x384xf32, #tpu.memory_space<vmem>>, vector<8x128xf32>,
    %c0_3 = arith.constant 0 : index
    %c0_4 = arith.constant 0 : index
    %2 = vector.load %arg1[%c0_3, %c0_4] : memref<128x128xf32, #tpu.memory_space<vmem>>, vector<128x128xf32>
    %c0_5 = arith.constant 0 : index
    %c0_6 = arith.constant 0 : index
    %3 = vector.load %arg2[%c0_5, %c0_6] : memref<3x128xf32, #tpu.memory_space<vmem>>, vector<3x128xf32>
    %4 = vector.extract_strided_slice %3 {offsets = [0, 0], sizes = [1, 128], strides = [1, 1]} : vector<3x128xf32> to vector<1x128xf32>
    %5 = vector.extract_strided_slice %3 {offsets = [1, 0], sizes = [1, 128], strides = [1, 1]} : vector<3x128xf32> to vector<1x128xf32>
    %6 = vector.extract_strided_slice %3 {offsets = [2, 0], sizes = [1, 128], strides = [1, 1]} : vector<3x128xf32> to vector<1x128xf32>
    %c0_7 = arith.constant 0 : index
    %c0_8 = arith.constant 0 : index
    %7 = vector.load %arg8[%c0_7, %c0_8] : memref<8x384xf32, #tpu.memory_space<vmem>>, vector<8x128xf32>
    %cst = arith.constant dense<0.000000e+00> : vector<8x128xf32>
    %8 = tpu.matmul %7, %2, %cst {dimension_numbers = #tpu.dot_dimension_numbers<[1], [0], [0], [1], [0, 0, 1, 1], [], []>} : vector<8x128xf32>, vector<128x128xf32>, vector<8x128xf32> -> vector<8x128xf32>
    %9 = vector.broadcast %4 : vector<1x128xf32> to vector<8x128xf32>
    %10 = arith.addf %8, %9 : vector<8x128xf32>
    %cst_9 = arith.constant dense<0.000000e+00> : vector<128xf32>
    %11 = vector.multi_reduction <add>, %10, %cst_9 [0] : vector<8x128xf32> to vector<128xf32>
    %12 = vector.shape_cast %11 : vector<128xf32> to vector<1x128xf32>
    %13 = arith.mulf %10, %10 : vector<8x128xf32>
    %cst_10 = arith.constant dense<0.000000e+00> : vector<128xf32>
    %14 = vector.multi_reduction <add>, %13, %cst_10 [0] : vector<8x128xf32> to vector<128xf32>
    %15 = vector.shape_cast %14 : vector<128xf32> to vector<1x128xf32>
    %cst_11 = arith.constant 1.250000e-01 : f32
    %16 = vector.broadcast %cst_11 : f32 to vector<1x128xf32>
    %17 = arith.mulf %12, %16 : vector<1x128xf32>
    %cst_12 = arith.constant 1.250000e-01 : f32
    %18 = vector.broadcast %cst_12 : f32 to vector<1x128xf32>
    %19 = arith.mulf %15, %18 : vector<1x128xf32>
    %20 = arith.mulf %17, %17 : vector<1x128xf32>
    %21 = arith.subf %19, %20 : vector<1x128xf32>
    %cst_13 = arith.constant 0.000000e+00 : f32
    %22 = vector.broadcast %cst_13 : f32 to vector<1x128xf32>
    %23 = arith.maximumf %21, %22 : vector<1x128xf32>
    %cst_14 = arith.constant 9.99999974E-6 : f32
    %24 = vector.broadcast %cst_14 : f32 to vector<1x128xf32>
    %25 = arith.addf %23, %24 : vector<1x128xf32>
    %26 = math.rsqrt %25 : vector<1x128xf32>
    %27 = arith.mulf %5, %26 : vector<1x128xf32>
    %28 = arith.mulf %17, %27 : vector<1x128xf32>
    %29 = arith.subf %6, %28 : vector<1x128xf32>
    %30 = vector.broadcast %27 : vector<1x128xf32> to vector<8x128xf32>
    %31 = arith.mulf %10, %30 : vector<8x128xf32>
    %32 = vector.broadcast %29 : vector<1x128xf32> to vector<8x128xf32>
    %33 = arith.addf %31, %32 : vector<8x128xf32>
    %cst_15 = arith.constant 0.000000e+00 : f32
    %34 = vector.broadcast %cst_15 : f32 to vector<8x128xf32>
    %35 = arith.maximumf %33, %34 : vector<8x128xf32>
    %c0_16 = arith.constant 0 : index
    %c128 = arith.constant 128 : index
    %36 = vector.load %arg8[%c0_16, %c128] : memref<8x384xf32, #tpu.memory_space<vmem>>, vector<8x128xf32>
    tpu.vector_store %arg8[%c0_16, %c128], %35 {strides = array<i32>} : memref<8x384xf32, #tpu.memory_space<vmem>>, vector<8x128xf32>,
    %c0_17 = arith.constant 0 : index
    %c0_18 = arith.constant 0 : index
    %37 = vector.load %arg3[%c0_17, %c0_18] : memref<256x128xf32, #tpu.memory_space<vmem>>, vector<256x128xf32>
    %c0_19 = arith.constant 0 : index
    %c0_20 = arith.constant 0 : index
    %38 = vector.load %arg4[%c0_19, %c0_20] : memref<3x128xf32, #tpu.memory_space<vmem>>, vector<3x128xf32>
    %39 = vector.extract_strided_slice %38 {offsets = [0, 0], sizes = [1, 128], strides = [1, 1]} : vector<3x128xf32> to vector<1x128xf32>
    %40 = vector.extract_strided_slice %38 {offsets = [1, 0], sizes = [1, 128], strides = [1, 1]} : vector<3x128xf32> to vector<1x128xf32>
    %41 = vector.extract_strided_slice %38 {offsets = [2, 0], sizes = [1, 128], strides = [1, 1]} : vector<3x128xf32> to vector<1x128xf32>
    %c0_21 = arith.constant 0 : index
    %c0_22 = arith.constant 0 : index
    %42 = vector.load %arg8[%c0_21, %c0_22] : memref<8x384xf32, #tpu.memory_space<vmem>>, vector<8x256xf32>
    %cst_23 = arith.constant dense<0.000000e+00> : vector<8x128xf32>
    %43 = tpu.matmul %42, %37, %cst_23 {dimension_numbers = #tpu.dot_dimension_numbers<[1], [0], [0], [1], [0, 0, 1, 1], [], []>} : vector<8x256xf32>, vector<256x128xf32>, vector<8x128xf32> -> vector<8x128xf32>
    %44 = vector.broadcast %39 : vector<1x128xf32> to vector<8x128xf32>
    %45 = arith.addf %43, %44 : vector<8x128xf32>
    %cst_24 = arith.constant dense<0.000000e+00> : vector<128xf32>
    %46 = vector.multi_reduction <add>, %45, %cst_24 [0] : vector<8x128xf32> to vector<128xf32>
    %47 = vector.shape_cast %46 : vector<128xf32> to vector<1x128xf32>
    %48 = arith.mulf %45, %45 : vector<8x128xf32>
    %cst_25 = arith.constant dense<0.000000e+00> : vector<128xf32>
    %49 = vector.multi_reduction <add>, %48, %cst_25 [0] : vector<8x128xf32> to vector<128xf32>
    %50 = vector.shape_cast %49 : vector<128xf32> to vector<1x128xf32>
    %cst_26 = arith.constant 1.250000e-01 : f32
    %51 = vector.broadcast %cst_26 : f32 to vector<1x128xf32>
    %52 = arith.mulf %47, %51 : vector<1x128xf32>
    %cst_27 = arith.constant 1.250000e-01 : f32
    %53 = vector.broadcast %cst_27 : f32 to vector<1x128xf32>
    %54 = arith.mulf %50, %53 : vector<1x128xf32>
    %55 = arith.mulf %52, %52 : vector<1x128xf32>
    %56 = arith.subf %54, %55 : vector<1x128xf32>
    %cst_28 = arith.constant 0.000000e+00 : f32
    %57 = vector.broadcast %cst_28 : f32 to vector<1x128xf32>
    %58 = arith.maximumf %56, %57 : vector<1x128xf32>
    %cst_29 = arith.constant 9.99999974E-6 : f32
    %59 = vector.broadcast %cst_29 : f32 to vector<1x128xf32>
    %60 = arith.addf %58, %59 : vector<1x128xf32>
    %61 = math.rsqrt %60 : vector<1x128xf32>
    %62 = arith.mulf %40, %61 : vector<1x128xf32>
    %63 = arith.mulf %52, %62 : vector<1x128xf32>
    %64 = arith.subf %41, %63 : vector<1x128xf32>
    %65 = vector.broadcast %62 : vector<1x128xf32> to vector<8x128xf32>
    %66 = arith.mulf %45, %65 : vector<8x128xf32>
    %67 = vector.broadcast %64 : vector<1x128xf32> to vector<8x128xf32>
    %68 = arith.addf %66, %67 : vector<8x128xf32>
    %cst_30 = arith.constant 0.000000e+00 : f32
    %69 = vector.broadcast %cst_30 : f32 to vector<8x128xf32>
    %70 = arith.maximumf %68, %69 : vector<8x128xf32>
    %c0_31 = arith.constant 0 : index
    %c256 = arith.constant 256 : index
    %71 = vector.load %arg8[%c0_31, %c256] : memref<8x384xf32, #tpu.memory_space<vmem>>, vector<8x128xf32>
    tpu.vector_store %arg8[%c0_31, %c256], %70 {strides = array<i32>} : memref<8x384xf32, #tpu.memory_space<vmem>>, vector<8x128xf32>,
    %c0_32 = arith.constant 0 : index
    %c0_33 = arith.constant 0 : index
    %72 = vector.load %arg5[%c0_32, %c0_33] : memref<384x128xf32, #tpu.memory_space<vmem>>, vector<384x128xf32>
    %c0_34 = arith.constant 0 : index
    %c0_35 = arith.constant 0 : index
    %73 = vector.load %arg6[%c0_34, %c0_35] : memref<1x128xf32, #tpu.memory_space<vmem>>, vector<1x128xf32>
    %c0_36 = arith.constant 0 : index
    %c0_37 = arith.constant 0 : index
    %74 = vector.load %arg8[%c0_36, %c0_37] : memref<8x384xf32, #tpu.memory_space<vmem>>, vector<8x384xf32>
    %cst_38 = arith.constant dense<0.000000e+00> : vector<8x128xf32>
    %75 = tpu.matmul %74, %72, %cst_38 {dimension_numbers = #tpu.dot_dimension_numbers<[1], [0], [0], [1], [0, 0, 1, 1], [], []>} : vector<8x384xf32>, vector<384x128xf32>, vector<8x128xf32> -> vector<8x128xf32>
    %76 = vector.broadcast %73 : vector<1x128xf32> to vector<8x128xf32>
    %77 = arith.addf %75, %76 : vector<8x128xf32>
    %c0_39 = arith.constant 0 : index
    %c0_40 = arith.constant 0 : index
    %78 = vector.load %arg7[%c0_39, %c0_40] : memref<8x128xf32, #tpu.memory_space<vmem>>, vector<8x128xf32>
    tpu.vector_store %arg7[%c0_39, %c0_40], %77 {strides = array<i32>} : memref<8x128xf32, #tpu.memory_space<vmem>>, vector<8x128xf32>,
    return
  }
}

</mosaic_0001>

<bundles_post_ra>
// kernel: generator_forward.1
= control target key start
LH: loop header
LB: loop body
LE: loop exit
PB: predicated region body
PF: predicated region fallthrough
CT: control target
= control target key end

     0   :  { %12 = vsyncpa [#allocation4], 0  ;;  %s1123_s0 = inlined_call_operand.vmem [shape: f32[8,128], index: 0, kind: input, shape index: {}]   ;;  %s1124_s1 = inlined_call_operand.hbm [shape: f32[128,128], index: 1, kind: input, shape index: {}]   ;;  %s1125_s2 = inlined_call_operand.vmem [shape: f32[3,128], index: 2, kind: input, shape index: {}]   ;;  %s1126_s3 = inlined_call_operand.hbm [shape: f32[256,128], index: 3, kind: input, shape index: {}]   ;;  %s1127_s4 = inlined_call_operand.vmem [shape: f32[3,128], index: 4, kind: input, shape index: {}]   ;;  %s1128_s5 = inlined_call_operand.hbm [shape: f32[384,128], index: 5, kind: input, shape index: {}]   ;;  %s1129_s6 = inlined_call_operand.vmem [shape: f32[1,128], index: 6, kind: input, shape index: {}]   ;;  %s1130_s7 = inlined_call_operand.hbm [shape: f32[8,128], index: 7, kind: output, shape index: {}]  }
   0x1   :  { %13 = vsyncpa [#allocation7], 0 }
   0x2   :  { %14 = vsyncpa [#allocation5], 0  ;;  %s956_s24 = smov [#allocation6]   ;;  %s957_s26 = smov [#allocation3]  }
   0x3   :  { %s36_s25 = sshll.u32 %s956_s24, 4  ;;  %s22_s27 = sshll.u32 %s957_s26, 4  ;;  %s37_s25 = int_to_ptr.vmem [resolvable:$true] %s36_s25  ;;  %s1005_s27 = int_to_ptr.vmem [resolvable:$true] %s22_s27 }
   0x4   :  { %s862_s30 = scalar_lea.hbm %s1126_s3, 4096 }
   0x5   :  { %p863_p0 = scmp.ne.s32.totalorder %s1126_s3, %s862_s30  ;;  %p866_p1 = scmp.lt.u32.totalorder %s862_s30, %s1126_s3 }
   0x7   :  { %p868_p2 = pnand %p866_p1, %p863_p0 }
   0x9   :  { %871 = shalt.err (!%p868_p2)
}
   0xa   :  { %s872_s12 = scalar_lea.vmem %s37_s25, 4096  ;;  %p877_p4 = scmp.lt.s32.totalorder %s37_s25, %s37_s25 }
   0xb   :  { %p873_p3 = scmp.ne.s32.totalorder %s37_s25, %s872_s12  ;;  %p878_p5 = scmp.lt.s32.totalorder %s872_s12, %s872_s12 }
   0xd   :  { %p879_p6 = por %p878_p5, %p877_p4 }
   0xf   :  { %p880_p7 = pnand %p879_p6, %p873_p3 }
  0x11   :  { %883 = shalt.err (!%p880_p7)
}
  0x12   :  { %s958_s13 = smov 128   ;;  %s959_s14 = smov 8  }
  0x13   :  { %42 = dma.hbm_to_vmem [thread:$0]  %s1126_s3, 4096, %s37_s25, [#allocation7], %s958_s13, %s958_s13, %s959_s14  }
  0x14   :  { %s884_s19 = scalar_lea.hbm %s1124_s1, 2048 }
  0x15   :  { %p885_p8 = scmp.ne.s32.totalorder %s1124_s1, %s884_s19  ;;  %p888_p9 = scmp.lt.u32.totalorder %s884_s19, %s1124_s1 }
  0x17   :  { %p890_p10 = pnand %p888_p9, %p885_p8 }
  0x19   :  { %893 = shalt.err (!%p890_p10)
}
  0x1a   :  { %s894_s24 = scalar_lea.vmem %s1005_s27, 2048  ;;  %p899_p12 = scmp.lt.s32.totalorder %s1005_s27, %s1005_s27 }
  0x1b   :  { %p895_p11 = scmp.ne.s32.totalorder %s1005_s27, %s894_s24  ;;  %p900_p13 = scmp.lt.s32.totalorder %s894_s24, %s894_s24 }
  0x1d   :  { %p901_p0 = por %p900_p13, %p899_p12 }
  0x1f   :  { %p902_p1 = pnand %p901_p0, %p895_p11 }
  0x21   :  { %905 = shalt.err (!%p902_p1)
}
  0x22   :  { %28 = dma.hbm_to_vmem [thread:$0]  %s1124_s1, 2048, %s1005_s27, [#allocation4], %s958_s13, %s958_s13, %s959_s14  }
  0x23   :  { %s960_s26 = smov [#allocation8]   ;;  %s906_s8 = scalar_lea.hbm %s1128_s5, 6144 }
  0x24   :  { %s50_s28 = sshll.u32 %s960_s26, 4  ;;  %p907_p2 = scmp.ne.s32.totalorder %s1128_s5, %s906_s8  ;;  %s51_s28 = int_to_ptr.vmem [resolvable:$true] %s50_s28 }
  0x25   :  { %p910_p3 = scmp.lt.u32.totalorder %s906_s8, %s1128_s5 }
  0x27   :  { %p912_p4 = pnand %p910_p3, %p907_p2 }
  0x29   :  { %915 = shalt.err (!%p912_p4)
}
  0x2a   :  { %s916_s15 = scalar_lea.vmem %s51_s28, 6144  ;;  %p921_p6 = scmp.lt.s32.totalorder %s51_s28, %s51_s28 }
  0x2b   :  { %p917_p5 = scmp.ne.s32.totalorder %s51_s28, %s916_s15  ;;  %p922_p7 = scmp.lt.s32.totalorder %s916_s15, %s916_s15 }
  0x2d   :  { %p923_p8 = por %p922_p7, %p921_p6 }
  0x2f   :  { %p924_p9 = pnand %p923_p8, %p917_p5 }
  0x31   :  { %927 = shalt.err (!%p924_p9)
}
  0x32   :  { %56 = dma.hbm_to_vmem [thread:$0]  %s1128_s5, 6144, %s51_s28, [#allocation7], %s958_s13, %s958_s13, %s959_s14  }
  0x33   :  { %950 = dma.done.wait [#allocation4], 2048  }
  0x34   :  { %951 = vsyncadd [#allocation4], 4294965248 }
  0x35   :  { %952 = dma.done.wait [#allocation7], 10240  }
  0x36   :  { %953 = vsyncadd [#allocation7], 4294957056  ;;  %v961_v0 = vmov 0.0|0.0   ;;  %vm962_vm0 = vmmov 0   ;;  %v963_v1 = vmov 0.0   ;;  %v70_v2 = vld [vmem:[#allocation3] sm:$0xff] }
  0x37   :  { %737 = vmatprep.subr.bf16.mxu0 %v961_v0  ;;  %699 = vmatprep.mubr.msk.f32.mxu0 %vm962_vm0, %v963_v1  ;;  %v71_v3 = vld [vmem:[#allocation3 + $0x8] sm:$0xff]  ;;  %v72_v4 = vld [vmem:[#allocation3 + $0x10] sm:$0xff]  ;;  %v73_v6 = vld [vmem:[#allocation3 + $0x18] sm:$0xff]  ;;  %s964_s18 = smov [#allocation9]  }
  0x38   :  { %v738_v5 = vpack.c.bf16 %v71_v3, %v70_v2  ;;  %v741_v7 = vpack.c.bf16 %v73_v6, %v72_v4  ;;  %v74_v8 = vld [vmem:[#allocation3 + $0x20] sm:$0xff]  ;;  %v75_v9 = vld [vmem:[#allocation3 + $0x28] sm:$0xff]  ;;  %v76_v11 = vld [vmem:[#allocation3 + $0x30] sm:$0xff]  ;;  %s552_s19 = sshll.u32 %s964_s18, 4  ;;  %s553_s19 = int_to_ptr.vmem [resolvable:$true] %s552_s19 }
  0x39   :  { %v744_v10 = vpack.c.bf16 %v75_v9, %v74_v8  ;;  %v77_v12 = vld [vmem:[#allocation3 + $0x38] sm:$0xff]  ;;  %v78_v14 = vld [vmem:[#allocation3 + $0x40] sm:$0xff]  ;;  %v79_v15 = vld [vmem:[#allocation3 + $0x48] sm:$0xff]  ;;  %s928_s20 = scalar_lea.vmem %s553_s19, 128  ;;  %p933_p11 = scmp.lt.s32.totalorder %s553_s19, %s553_s19 }
  0x3a   :  { %739 = vmatpush3.bf16.msra.mxu0 %v738_v5  ;;  %v747_v13 = vpack.c.bf16 %v77_v12, %v76_v11  ;;  %v750_v16 = vpack.c.bf16 %v79_v15, %v78_v14  ;;  %v80_v17 = vld [vmem:[#allocation3 + $0x50] sm:$0xff]  ;;  %v81_v18 = vld [vmem:[#allocation3 + $0x58] sm:$0xff]  ;;  %v82_v20 = vld [vmem:[#allocation3 + $0x60] sm:$0xff]  ;;  %p929_p10 = scmp.ne.s32.totalorder %s553_s19, %s928_s20  ;;  %p934_p12 = scmp.lt.s32.totalorder %s928_s20, %s928_s20 }
  0x3b   :  { %740 = vmatprep.subr.bf16.mxu0 %v961_v0  ;;  %v753_v19 = vpack.c.bf16 %v81_v18, %v80_v17  ;;  %v83_v21 = vld [vmem:[#allocation3 + $0x68] sm:$0xff]  ;;  %v84_v23 = vld [vmem:[#allocation3 + $0x70] sm:$0xff]  ;;  %v85_v24 = vld [vmem:[#allocation3 + $0x78] sm:$0xff] }
  0x3c   :  { %v756_v22 = vpack.c.bf16 %v83_v21, %v82_v20  ;;  %v759_v25 = vpack.c.bf16 %v85_v24, %v84_v23  ;;  %v1070_v26 = vld [vmem:[%s1123_s0] sm:$0xff]  ;;  %v217_v28 = vld [vmem:[#allocation6 + $0x88] sm:$0xff]  ;;  %v218_v33 = vld [vmem:[#allocation6 + $0x90] sm:$0xff]  ;;  %p935_p13 = por %p934_p12, %p933_p11 }
  0x3d   :  { %v216_v27 = vld [vmem:[#allocation6 + $0x80] sm:$0xff]  ;;  %v201_v31 = vld [vmem:[#allocation6 + $0x8] sm:$0xff]  ;;  %v219_v34 = vld [vmem:[#allocation6 + $0x98] sm:$0xff] }
  0x3e   :  { %742 = vmatpush3.bf16.msra.mxu0 %v741_v7  ;;  %v761_v29 = vpack.c.bf16 %v217_v28, %v216_v27  ;;  %v200_v30 = vld [vmem:[#allocation6] sm:$0xff]  ;;  %v765_v35 = vpack.c.bf16 %v219_v34, %v218_v33  ;;  %v202_v36 = vld [vmem:[#allocation6 + $0x10] sm:$0xff]  ;;  %v203_v37 = vld [vmem:[#allocation6 + $0x18] sm:$0xff]  ;;  %p936_p0 = pnand %p935_p13, %p929_p10 }
  0x3f   :  { %743 = vmatprep.subr.bf16.mxu0 %v961_v0  ;;  %v763_v32 = vpack.c.bf16 %v201_v31, %v200_v30  ;;  %v767_v38 = vpack.c.bf16 %v203_v37, %v202_v36  ;;  %v220_v39 = vld [vmem:[#allocation6 + $0xa0] sm:$0xff]  ;;  %v221_v40 = vld [vmem:[#allocation6 + $0xa8] sm:$0xff]  ;;  %v222_v45 = vld [vmem:[#allocation6 + $0xb0] sm:$0xff] }
  0x40   :  { %762 = vmatprep.subr.bf16.mxu1 %v761_v29  ;;  %v769_v41 = vpack.c.bf16 %v221_v40, %v220_v39  ;;  %v204_v42 = vld [vmem:[#allocation6 + $0x20] sm:$0xff]  ;;  %v205_v43 = vld [vmem:[#allocation6 + $0x28] sm:$0xff]  ;;  %v223_v46 = vld [vmem:[#allocation6 + $0xb8] sm:$0xff] }
  0x41   :  { %764 = vmatpush3.bf16.msra.mxu1 %v763_v32  ;;  %v771_v44 = vpack.c.bf16 %v205_v43, %v204_v42  ;;  %v773_v47 = vpack.c.bf16 %v223_v46, %v222_v45  ;;  %v206_v48 = vld [vmem:[#allocation6 + $0x30] sm:$0xff]  ;;  %v207_v49 = vld [vmem:[#allocation6 + $0x38] sm:$0xff]  ;;  %v224_v51 = vld [vmem:[#allocation6 + $0xc0] sm:$0xff] }
  0x42   :  { %745 = vmatpush3.bf16.msra.mxu0 %v744_v10  ;;  %766 = vmatprep.subr.bf16.mxu1 %v765_v35  ;;  %v775_v50 = vpack.c.bf16 %v207_v49, %v206_v48  ;;  %v225_v52 = vld [vmem:[#allocation6 + $0xc8] sm:$0xff]  ;;  %v208_v54 = vld [vmem:[#allocation6 + $0x40] sm:$0xff]  ;;  %v226_v57 = vld [vmem:[#allocation6 + $0xd0] sm:$0xff] }
  0x43   :  { %746 = vmatprep.subr.bf16.mxu0 %v961_v0  ;;  %v777_v53 = vpack.c.bf16 %v225_v52, %v224_v51  ;;  %v209_v55 = vld [vmem:[#allocation6 + $0x48] sm:$0xff]  ;;  %v227_v58 = vld [vmem:[#allocation6 + $0xd8] sm:$0xff]  ;;  %v210_v59 = vld [vmem:[#allocation6 + $0x50] sm:$0xff] }
  0x44   :  { %v779_v56 = vpack.c.bf16 %v209_v55, %v208_v54  ;;  %v781_v60 = vpack.c.bf16 %v227_v58, %v226_v57  ;;  %v211_v61 = vld [vmem:[#allocation6 + $0x58] sm:$0xff]  ;;  %v228_v62 = vld [vmem:[#allocation6 + $0xe0] sm:$0xff]  ;;  %v229_v63 = vld [vmem:[#allocation6 + $0xe8] sm:$0xff] }
  0x45   :  { %768 = vmatpush3.bf16.msra.mxu1 %v767_v38  ;;  %v783_v2 = vpack.c.bf16 %v211_v61, %v210_v59  ;;  %v785_v3 = vpack.c.bf16 %v229_v63, %v228_v62  ;;  %v212_v4 = vld [vmem:[#allocation6 + $0x60] sm:$0xff]  ;;  %v213_v5 = vld [vmem:[#allocation6 + $0x68] sm:$0xff]  ;;  %v230_v6 = vld [vmem:[#allocation6 + $0xf0] sm:$0xff] }
  0x46   :  { %748 = vmatpush3.bf16.msra.mxu0 %v747_v13  ;;  %770 = vmatprep.subr.bf16.mxu1 %v769_v41  ;;  %v231_v7 = vld [vmem:[#allocation6 + $0xf8] sm:$0xff]  ;;  %v787_v8 = vpack.c.bf16 %v213_v5, %v212_v4  ;;  %v214_v10 = vld [vmem:[#allocation6 + $0x70] sm:$0xff]  ;;  %v88_v13 = vlaneseq  ;;  %v364_v54 = vld [vmem:[#allocation8 + $0x88] sm:$0xff] }
  0x47   :  { %749 = vmatprep.subr.bf16.mxu0 %v961_v0  ;;  %v789_v9 = vpack.c.bf16 %v231_v7, %v230_v6  ;;  %v215_v11 = vld [vmem:[#allocation6 + $0x78] sm:$0xff]  ;;  %v348_v57 = vld [vmem:[#allocation8 + $0x8] sm:$0xff]  ;;  %v365_v59 = vld [vmem:[#allocation8 + $0x90] sm:$0xff] }
  0x48   :  { %v791_v12 = vpack.c.bf16 %v215_v11, %v214_v10  ;;  %v1074_v14 = vshrl.u32 %v88_v13, 7  ;;  %v349_v62 = vld [vmem:[#allocation8 + $0x10] sm:$0xff]  ;;  %v350_v63 = vld [vmem:[#allocation8 + $0x18] sm:$0xff]  ;;  %v380_v4 = vld [vmem:[#allocation8 + $0x108] sm:$0xff] }
  0x49   :  { %772 = vmatpush3.bf16.msra.mxu1 %v771_v44  ;;  %v368_v6 = vld [vmem:[#allocation8 + $0xa8] sm:$0xff]  ;;  %v381_v11 = vld [vmem:[#allocation8 + $0x110] sm:$0xff] }
  0x4a   :  { %751 = vmatpush3.bf16.msra.mxu0 %v750_v16  ;;  %774 = vmatprep.subr.bf16.mxu1 %v773_v47  ;;  %v90_v15 = vsub.s32 0, %v1074_v14  ;;  %v86_v16 = vld [vmem:[%s1125_s2] sm:$0x7]  ;;  %v190_v43 = vsub.s32 1, %v1074_v14  ;;  %v195_v47 = vsub.s32 2, %v1074_v14 }
  0x4b   :  { %752 = vmatprep.subr.bf16.mxu0 %v961_v0 }
  0x4c   :  { %v91_v17 = vrot.slane %v86_v16, %v90_v15 }
  0x4d   :  { %776 = vmatpush3.bf16.msra.mxu1 %v775_v50 }
  0x4e   :  { %754 = vmatpush3.bf16.msra.mxu0 %v753_v19  ;;  %778 = vmatprep.subr.bf16.mxu1 %v777_v53  ;;  %v363_v53 = vld [vmem:[#allocation8 + $0x80] sm:$0xff] }
  0x4f   :  { %755 = vmatprep.subr.bf16.mxu0 %v961_v0  ;;  %v793_v55 = vpack.c.bf16 %v364_v54, %v363_v53  ;;  %v390_v53 = vld [vmem:[#allocation8 + $0x158] sm:$0xff] }
  0x51   :  { %780 = vmatpush3.bf16.msra.mxu1 %v779_v56  ;;  %v347_v56 = vld [vmem:[#allocation8] sm:$0xff] }
  0x52   :  { %757 = vmatpush3.bf16.msra.mxu0 %v756_v22  ;;  %782 = vmatprep.subr.bf16.mxu1 %v781_v60  ;;  %v795_v58 = vpack.c.bf16 %v348_v57, %v347_v56  ;;  %v366_v60 = vld [vmem:[#allocation8 + $0x98] sm:$0xff] }
  0x53   :  { %758 = vmatprep.subr.bf16.mxu0 %v961_v0  ;;  %v797_v61 = vpack.c.bf16 %v366_v60, %v365_v59  ;;  %v378_v56 = vld [vmem:[#allocation8 + $0xf8] sm:$0xff] }
  0x54   :  { %v362_v59 = vld [vmem:[#allocation8 + $0x78] sm:$0xff] }
  0x55   :  { %784 = vmatpush3.bf16.msra.mxu1 %v783_v2  ;;  %v799_v2 = vpack.c.bf16 %v350_v63, %v349_v62  ;;  %v392_v62 = vld [vmem:[#allocation8 + $0x168] sm:$0xff] }
  0x56   :  { %760 = vmatpush3.bf16.msra.mxu0 %v759_v25  ;;  %786 = vmatprep.subr.bf16.mxu1 %v785_v3  ;;  %v379_v3 = vld [vmem:[#allocation8 + $0x100] sm:$0xff] }
  0x57   :  { %794 = vmatprep.subr.bf16.mxu0 %v793_v55  ;;  %v826_v5 = vpack.c.bf16 %v380_v4, %v379_v3  ;;  %v377_v55 = vld [vmem:[#allocation8 + $0xf0] sm:$0xff]  ;;  %v394_v3 = vld [vmem:[#allocation8 + $0x178] sm:$0xff] }
  0x58   :  { %v821_v57 = vpack.c.bf16 %v378_v56, %v377_v55 }
  0x59   :  { %700 = vmatmul.mubr.f32.vlgmr.msra.gmra.mrb[0].mxu0 %v1070_v26  ;;  %788 = vmatpush3.bf16.msra.mxu1 %v787_v8  ;;  %v351_v8 = vld [vmem:[#allocation8 + $0x20] sm:$0xff] }
  0x5a   :  { %790 = vmatprep.subr.bf16.mxu1 %v789_v9  ;;  %796 = vmatpush3.bf16.msra.mxu0 %v795_v58  ;;  %v352_v9 = vld [vmem:[#allocation8 + $0x28] sm:$0xff]  ;;  %v361_v58 = vld [vmem:[#allocation8 + $0x70] sm:$0xff] }
  0x5b   :  { %798 = vmatprep.subr.bf16.mxu0 %v797_v61  ;;  %v803_v10 = vpack.c.bf16 %v352_v9, %v351_v8  ;;  %v823_v60 = vpack.c.bf16 %v362_v59, %v361_v58  ;;  %v391_v61 = vld [vmem:[#allocation8 + $0x160] sm:$0xff] }
  0x5c   :  { %v844_v63 = vpack.c.bf16 %v392_v62, %v391_v61 }
  0x5d   :  { %792 = vmatpush3.bf16.msra.mxu1 %v791_v12  ;;  %v382_v12 = vld [vmem:[#allocation8 + $0x118] sm:$0xff] }
  0x5e   :  { %825 = vmatprep.subr.bf16.mxu1 %v961_v0  ;;  %800 = vmatpush3.bf16.msra.mxu0 %v799_v2  ;;  %v829_v13 = vpack.c.bf16 %v382_v12, %v381_v11  ;;  %v393_v2 = vld [vmem:[#allocation8 + $0x170] sm:$0xff] }
  0x5f   :  { %v847_v4 = vpack.c.bf16 %v394_v3, %v393_v2 }
 0x12c   :  { %v158_v18 = vpop.f32.mrb[0].mxu0 }
 0x12d   :  { %v159_v19 = vadd.f32 %v158_v18, %v91_v17  ;;  %v701_v20 = vpop.f32.mrb[1].mxu0  ;;  %v370_v17 = vld [vmem:[#allocation8 + $0xb8] sm:$0xff] }
 0x12e   :  { %v354_v20 = vld [vmem:[#allocation8 + $0x38] sm:$0xff] }
 0x12f   :  { %v162_v21 = vrot.slane %v159_v19, 4  ;;  %v168_v22 = vmul.f32 %v159_v19, %v159_v19 }
 0x131   :  { %v163_v23 = vadd.f32 %v162_v21, %v159_v19  ;;  %v169_v24 = vrot.slane %v168_v22, 4 }
 0x133   :  { %v164_v25 = vrot.slane %v163_v23, 2  ;;  %v170_v27 = vadd.f32 %v169_v24, %v168_v22  ;;  %v383_v22 = vld [vmem:[#allocation8 + $0x120] sm:$0xff] }
 0x135   :  { %v165_v28 = vadd.f32 %v164_v25, %v163_v23  ;;  %v171_v29 = vrot.slane %v170_v27, 2  ;;  %v384_v23 = vld [vmem:[#allocation8 + $0x128] sm:$0xff]  ;;  %v371_v25 = vld [vmem:[#allocation8 + $0xc0] sm:$0xff] }
 0x136   :  { %v832_v24 = vpack.c.bf16 %v384_v23, %v383_v22 }
 0x137   :  { %v166_v30 = vrot.slane %v165_v28, 1  ;;  %v172_v31 = vadd.f32 %v171_v29, %v170_v27  ;;  %v372_v27 = vld [vmem:[#allocation8 + $0xc8] sm:$0xff]  ;;  %v355_v29 = vld [vmem:[#allocation8 + $0x40] sm:$0xff] }
 0x139   :  { %v167_v32 = vadd.f32 %v166_v30, %v165_v28  ;;  %v173_v33 = vrot.slane %v172_v31, 1  ;;  %v809_v28 = vpack.c.bf16 %v372_v27, %v371_v25  ;;  %v356_v30 = vld [vmem:[#allocation8 + $0x48] sm:$0xff] }
 0x13b   :  { %v174_v34 = vadd.f32 %v173_v33, %v172_v31  ;;  %v175_v35 = vmul.f32 0.125, %v167_v32  ;;  %v811_v31 = vpack.c.bf16 %v356_v30, %v355_v29  ;;  %v385_v32 = vld [vmem:[#allocation8 + $0x130] sm:$0xff]  ;;  %v386_v33 = vld [vmem:[#allocation8 + $0x138] sm:$0xff] }
 0x13d   :  { %v176_v36 = vmul.f32 0.125, %v174_v34  ;;  %v177_v37 = vmul.f32 %v175_v35, %v175_v35  ;;  %v835_v34 = vpack.c.bf16 %v386_v33, %v385_v32 }
 0x13f   :  { %v178_v38 = vsub.f32 %v176_v36, %v177_v37  ;;  %v374_v36 = vld [vmem:[#allocation8 + $0xd8] sm:$0xff] }
 0x141   :  { %v179_v39 = vmax.f32 %v178_v38, 0.0  ;;  %v357_v38 = vld [vmem:[#allocation8 + $0x50] sm:$0xff] }
 0x143   :  { %v180_v40 = vadd.f32 1e-05, %v179_v39  ;;  %v358_v39 = vld [vmem:[#allocation8 + $0x58] sm:$0xff] }
 0x145   :  { %858 = vrsqrt.f32 %v180_v40  ;;  %v815_v40 = vpack.c.bf16 %v358_v39, %v357_v38 }
 0x14f   :  { %v859_v41 = vpop.eup %858 }
 0x150   :  { %v182_v42 = vmul.f32 %v859_v41, %v86_v16  ;;  %v387_v41 = vld [vmem:[#allocation8 + $0x140] sm:$0xff] }
 0x152   :  { %v183_v44 = vmul.f32 %v182_v42, %v175_v35  ;;  %v191_v46 = vrot.slane %v182_v42, %v190_v43  ;;  %v373_v35 = vld [vmem:[#allocation8 + $0xd0] sm:$0xff]  ;;  %v388_v42 = vld [vmem:[#allocation8 + $0x148] sm:$0xff] }
 0x153   :  { %v813_v37 = vpack.c.bf16 %v374_v36, %v373_v35 }
 0x154   :  { %v185_v45 = vrot.slane %v183_v44, 7  ;;  %v192_v49 = vmul.f32 %v191_v46, %v159_v19  ;;  %v353_v19 = vld [vmem:[#allocation8 + $0x30] sm:$0xff]  ;;  %v838_v44 = vpack.c.bf16 %v388_v42, %v387_v41  ;;  %v376_v46 = vld [vmem:[#allocation8 + $0xe8] sm:$0xff]  ;;  %v562_v42 = vld [vmem:[%s1129_s6] ss:$0 sm:$0xff] }
 0x155   :  { %v807_v21 = vpack.c.bf16 %v354_v20, %v353_v19 }
 0x156   :  { %v187_v48 = vsub.f32 %v86_v16, %v185_v45  ;;  %v369_v16 = vld [vmem:[#allocation8 + $0xb0] sm:$0xff]  ;;  %v375_v45 = vld [vmem:[#allocation8 + $0xe0] sm:$0xff] }
 0x157   :  { %v805_v18 = vpack.c.bf16 %v370_v17, %v369_v16 }
 0x158   :  { %v196_v50 = vrot.slane %v187_v48, %v195_v47  ;;  %v817_v48 = vpack.c.bf16 %v376_v46, %v375_v45 }
 0x15a   :  { %v197_v51 = vadd.f32 %v196_v50, %v192_v49  ;;  %v359_v49 = vld [vmem:[#allocation8 + $0x60] sm:$0xff]  ;;  %v360_v50 = vld [vmem:[#allocation8 + $0x68] sm:$0xff] }
 0x15c   :  { %v198_v52 = vmax.f32 %v197_v51, 0.0  ;;  %v819_v51 = vpack.c.bf16 %v360_v50, %v359_v49 }
 0x15e   :  { %303 = vmatprep.mubr.f32.mxu1 %v198_v52  ;;  %469 = vmatprep.mubr.f32.mxu0 %v198_v52  ;;  %v389_v52 = vld [vmem:[#allocation8 + $0x150] sm:$0xff] }
 0x15f   :  { %304 = vmatmul.mubr.f32.vlgmr.msra.gmra.mrb[0].mxu1 %v1070_v26  ;;  %v841_v54 = vpack.c.bf16 %v390_v53, %v389_v52 }
 0x160   :  { %734 = vmatprep.mubr.msk.f32.mxu1 %vm962_vm0, %v963_v1  ;;  %v367_v1 = vld [vmem:[#allocation8 + $0xa0] sm:$0xff]  ;;  %827 = vmatpush3.bf16.msra.mxu1 %v826_v5 }
 0x161   :  { %v801_v7 = vpack.c.bf16 %v368_v6, %v367_v1  ;;  %828 = vmatprep.subr.bf16.mxu1 %v961_v0  ;;  %v232_v5 = vld [vmem:[%s1127_s4] sm:$0x7] }
 0x162   :  { %v238_v6 = vrot.slane %v232_v5, %v90_v15 }
 0x163   :  { %802 = vmatprep.subr.bf16.mxu0 %v801_v7 }
 0x164   :  { %804 = vmatpush3.bf16.msra.mxu0 %v803_v10  ;;  %830 = vmatpush3.bf16.msra.mxu1 %v829_v13 }
 0x165   :  { %806 = vmatprep.subr.bf16.mxu0 %v805_v18  ;;  %831 = vmatprep.subr.bf16.mxu1 %v961_v0 }
 0x168   :  { %808 = vmatpush3.bf16.msra.mxu0 %v807_v21  ;;  %833 = vmatpush3.bf16.msra.mxu1 %v832_v24 }
 0x169   :  { %810 = vmatprep.subr.bf16.mxu0 %v809_v28  ;;  %834 = vmatprep.subr.bf16.mxu1 %v961_v0 }
 0x16c   :  { %812 = vmatpush3.bf16.msra.mxu0 %v811_v31  ;;  %836 = vmatpush3.bf16.msra.mxu1 %v835_v34 }
 0x16d   :  { %814 = vmatprep.subr.bf16.mxu0 %v813_v37  ;;  %837 = vmatprep.subr.bf16.mxu1 %v961_v0 }
 0x170   :  { %816 = vmatpush3.bf16.msra.mxu0 %v815_v40  ;;  %839 = vmatpush3.bf16.msra.mxu1 %v838_v44 }
 0x171   :  { %818 = vmatprep.subr.bf16.mxu0 %v817_v48  ;;  %840 = vmatprep.subr.bf16.mxu1 %v961_v0 }
 0x174   :  { %820 = vmatpush3.bf16.msra.mxu0 %v819_v51  ;;  %842 = vmatpush3.bf16.msra.mxu1 %v841_v54 }
 0x175   :  { %822 = vmatprep.subr.bf16.mxu0 %v821_v57  ;;  %843 = vmatprep.subr.bf16.mxu1 %v961_v0 }
 0x178   :  { %824 = vmatpush3.bf16.msra.mxu0 %v823_v60  ;;  %845 = vmatpush3.bf16.msra.mxu1 %v844_v63 }
 0x179   :  { %846 = vmatprep.subr.bf16.mxu1 %v961_v0 }
 0x17b   :  { %470 = vmatmul.mubr.f32.vlgmr.msra.gmra.mrb[2].mxu0 %v1070_v26 }
 0x17c   :  { %848 = vmatpush3.bf16.msra.mxu1 %v847_v4 }
 0x232   :  { %v612_v1 = vpop.f32.mrb[0].mxu1 }
 0x233   :  { %v613_v7 = vpop.f32.mrb[1].mxu1 }
 0x234   :  { %v614_v8 = vadd.f32 %v613_v7, %v612_v1 }
 0x236   :  { %v306_v9 = vadd.f32 %v614_v8, %v238_v6 }
 0x238   :  { %v309_v10 = vrot.slane %v306_v9, 4  ;;  %v315_v11 = vmul.f32 %v306_v9, %v306_v9 }
 0x23a   :  { %v310_v12 = vadd.f32 %v309_v10, %v306_v9  ;;  %v316_v13 = vrot.slane %v315_v11, 4 }
 0x23c   :  { %v311_v16 = vrot.slane %v310_v12, 2  ;;  %v317_v26 = vadd.f32 %v316_v13, %v315_v11 }
 0x23e   :  { %v312_v17 = vadd.f32 %v311_v16, %v310_v12  ;;  %v318_v0 = vrot.slane %v317_v26, 2 }
 0x240   :  { %v313_v18 = vrot.slane %v312_v17, 1  ;;  %v319_v19 = vadd.f32 %v318_v0, %v317_v26 }
 0x242   :  { %v314_v20 = vadd.f32 %v313_v18, %v312_v17  ;;  %v320_v21 = vrot.slane %v319_v19, 1 }
 0x244   :  { %v321_v22 = vadd.f32 %v320_v21, %v319_v19  ;;  %v322_v23 = vmul.f32 0.125, %v314_v20 }
 0x246   :  { %v323_v24 = vmul.f32 0.125, %v321_v22  ;;  %v324_v25 = vmul.f32 %v322_v23, %v322_v23 }
 0x248   :  { %v325_v15 = vsub.f32 %v323_v24, %v324_v25 }
 0x24a   :  { %v326_v27 = vmax.f32 %v325_v15, 0.0 }
 0x24c   :  { %v327_v28 = vadd.f32 1e-05, %v326_v27 }
 0x24e   :  { %860 = vrsqrt.f32 %v327_v28  ;;  %v647_v39 = vpop.f32.mrb[2].mxu0 }
 0x24f   :  { %v648_v40 = vpop.f32.mrb[3].mxu0 }
 0x250   :  { %v649_v41 = vadd.f32 %v648_v40, %v647_v39 }
 0x252   :  { %v472_v44 = vadd.f32 %v649_v41, %v562_v42 }
 0x258   :  { %v861_v29 = vpop.eup %860 }
 0x259   :  { %v329_v30 = vmul.f32 %v861_v29, %v232_v5 }
 0x25b   :  { %v330_v31 = vmul.f32 %v329_v30, %v322_v23  ;;  %v338_v33 = vrot.slane %v329_v30, %v190_v43 }
 0x25d   :  { %v332_v32 = vrot.slane %v330_v31, 7  ;;  %v339_v35 = vmul.f32 %v338_v33, %v306_v9 }
 0x25f   :  { %v334_v34 = vsub.f32 %v232_v5, %v332_v32 }
 0x261   :  { %v343_v36 = vrot.slane %v334_v34, %v195_v47 }
 0x263   :  { %v344_v37 = vadd.f32 %v343_v36, %v339_v35 }
 0x265   :  { %v345_v38 = vmax.f32 %v344_v37, 0.0 }
 0x267   :  { %735 = vmatmul.mubr.f32.vlgmr.msra.gmra.mrb[2].mxu1 %v345_v38 }
 0x33a   :  { %v541_v45 = vpop.f32.mrb[2].mxu1 }
 0x33b   :  { %v542_v43 = vadd.f32 %v541_v45, %v472_v44  ;;  %v736_v46 = vpop.f32.mrb[3].mxu1 }
 0x33d   :  { %545 = vst [vmem:[#allocation9] sm:$0xff] %v542_v43 }
 0x33e   :  { %939 = shalt.err (!%p936_p0)
}
 0x33f   :  { %s940_s23 = scalar_lea.hbm %s1130_s7, 128 }
 0x340   :  { %p941_p1 = scmp.ne.s32.totalorder %s1130_s7, %s940_s23  ;;  %p944_p2 = scmp.lt.u32.totalorder %s940_s23, %s1130_s7 }
 0x342   :  { %p946_p3 = pnand %p944_p2, %p941_p1 }
 0x344   :  { %949 = shalt.err (!%p946_p3)
}
 0x345   :  { %555 = dma.vmem_to_hbm [thread:$0]  %s553_s19, 128, %s1130_s7, [#allocation5]  }
 0x346   :  { %954 = dma.done.wait [#allocation5], 128  }
 0x347   :  { %955 = vsyncadd [#allocation5], 4294967168 }
 0x348   :  { %559 = vsyncpa [#allocation4], 1 }
 0x349   :  { %560 = vsyncpa [#allocation7], 1 }
 0x34a   :  { %561 = vsyncpa [#allocation5], 1 }

</bundles_post_ra>
